<compile_context>
chip_gen: v7x
topology: tpu7x:2x2x1
jax: 0.10.0
libtpu: 0.0.40
codegen_flags: <defaults>
</compile_context>

<pallas_src>
import jax
import jax.numpy as jnp
from jax.experimental import pallas as pl
from jax.experimental.pallas import tpu as pltpu


DEFAULT_TILE_N = 1024           # row tile (multiple of 8)
MAX_TILE_O = 2048               # O tile cap for very wide heads
SMALL_PROBLEM_ELEMS = 100_000   # below this, XLA's fused gemm wins


def _round_up(x, m):
    return ((x + m - 1) // m) * m


def prepare_linear_params(weight, bias, *, param_dtype=jnp.bfloat16):
    """One-time parameter prep (done at init, NOT per forward call).

    weight: [out_feats, hid_feats]  (PyTorch nn.Linear layout)
    bias:   [out_feats]
    returns (w_t [hid_feats, O_pad] param_dtype, b2 [1, O_pad] f32, out_feats)

    K (hid_feats) is intentionally left unpadded: the kernel uses a whole-K
    block (block dim == full array dim), so no (8,128) constraint applies there.
    """
    out_feats, hid_feats = weight.shape
    o_pad = _round_up(out_feats, 128)           # lane-dense output columns
    w_t = jnp.pad(weight.T, ((0, 0), (0, o_pad - out_feats))).astype(param_dtype)
    b2 = jnp.pad(bias.astype(jnp.float32), (0, o_pad - out_feats)).reshape(1, o_pad)
    return w_t, b2, out_feats


def _linear_kernel(h_ref, w_ref, b_ref, o_ref):
    """One (row-tile, O-tile) step of o = h @ w + b, whole K in one dot."""
    h_bf = h_ref[...].astype(w_ref.dtype)       # in-kernel cast for the MXU
    acc = jnp.dot(h_bf, w_ref[...], preferred_element_type=jnp.float32)
    o_ref[...] = (acc + b_ref[...]).astype(o_ref.dtype)


def classify_emb_pallas(h, w_t, b2, out_feats, *, tile_n=DEFAULT_TILE_N,
                        force_pallas=False):
    """Pallas equivalent of GCNBaseNNet.classify_emb (nn.Linear).

    h:   [N, hid_feats]   (any float dtype; cast to bf16 inside the kernel)
    w_t: [hid_feats, O_pad]  from prepare_linear_params
    b2:  [1, O_pad]          f32, from prepare_linear_params
    returns [N, out_feats] in h.dtype
    """
    n, hid_feats = h.shape
    hk, o_pad = w_t.shape
    assert hk == hid_feats, "prepared weight K dim must match h"
    out_dtype = h.dtype

    # Tiny problems: fixed pallas_call launch/pipeline overhead dominates.
    if (not force_pallas) and n * hid_feats < SMALL_PROBLEM_ELEMS:
        y = (h.astype(jnp.float32) @ w_t[:, :out_feats].astype(jnp.float32)
             + b2[0, :out_feats])
        return y.astype(out_dtype)

    # ---- generation-aware tile sizing -------------------------------------
    try:
        vmem_cap = int(pltpu.get_tpu_info().vmem_capacity_bytes)
    except Exception:
        vmem_cap = 64 * 1024 * 1024
    budget = int(vmem_cap * 0.75)

    w_isz = jnp.dtype(w_t.dtype).itemsize
    h_isz = jnp.dtype(h.dtype).itemsize
    o_isz = jnp.dtype(out_dtype).itemsize

    # O tiling only matters for very wide heads; classifier heads -> 1 block.
    tile_o = min(o_pad, MAX_TILE_O)
    while tile_o > 128 and 2 * hid_feats * tile_o * w_isz > budget // 3:
        tile_o = max(128, (tile_o // 2 // 128) * 128)

    # Row tiling: large default tile; >=2 blocks for big N (v7x megacore);
    # shrink until the (double-buffered) working set fits the VMEM budget.
    tile_n = max(8, _round_up(tile_n, 8))
    tile_n_eff = min(tile_n, _round_up(n, 8))
    if n >= 512:
        tile_n_eff = min(tile_n_eff, _round_up(-(-n // 2), 8))

    def footprint(tn):
        return (2 * tn * hid_feats * h_isz          # h tiles (double-buffered)
                + 2 * hid_feats * tile_o * w_isz    # resident weight block
                + 2 * tile_o * 4                    # bias
                + 2 * tn * tile_o * o_isz)          # output tiles

    while tile_n_eff > 8 and footprint(tile_n_eff) > budget:
        tile_n_eff = max(8, _round_up(tile_n_eff // 2, 8))

    rows = pl.cdiv(n, tile_n_eff)
    o_blocks = pl.cdiv(o_pad, tile_o)
    vmem_limit = int(min(vmem_cap * 0.9,
                         max(32 * 1024 * 1024, 2 * footprint(tile_n_eff))))

    cost = pl.CostEstimate(
        flops=2 * n * hid_feats * o_pad,
        transcendentals=0,
        bytes_accessed=int(n * hid_feats * h_isz          # h read once
                           + hid_feats * o_pad * w_isz    # W read once (resident)
                           + o_pad * 4                     # bias
                           + n * o_pad * o_isz),           # output write
    )

    out = pl.pallas_call(
        _linear_kernel,
        out_shape=jax.ShapeDtypeStruct((n, o_pad), out_dtype),
        grid_spec=pltpu.PrefetchScalarGridSpec(
            num_scalar_prefetch=0,
            grid=(rows, o_blocks),
            in_specs=[
                # h: whole-K block, partial edge block along rows is safe.
                pl.BlockSpec((tile_n_eff, hid_feats), lambda i, j: (i, 0)),
                # W: whole-K, constant along the row axis -> fetched once.
                pl.BlockSpec((hid_feats, tile_o), lambda i, j: (0, j)),
                # bias
                pl.BlockSpec((1, tile_o), lambda i, j: (0, j)),
            ],
            out_specs=pl.BlockSpec((tile_n_eff, tile_o), lambda i, j: (i, j)),
        ),
        compiler_params=pltpu.CompilerParams(
            dimension_semantics=("parallel", "parallel"),
            vmem_limit_bytes=vmem_limit,
        ),
        cost_estimate=cost,
    )(h, w_t, b2)

    return out[:, :out_feats]


def gcn_base_forward(g, h, w_t, b2, out_feats, **kwargs):
    """Forward of GCNBaseNNet: get_embedding (abstract) + classify_emb."""
    # TODO(synk): get_embedding(g, h) is abstract in GCNBaseNNet (no concrete
    # GNN message passing in the base class); identity pass-through is used.
    emb = h
    return classify_emb_pallas(emb, w_t, b2, out_feats, **kwargs)


def init_linear_params(key, hid_feats, out_feats, dtype=jnp.float32):
    """Deterministic init mimicking torch.nn.Linear default U[-1/sqrt(in), 1/sqrt(in)]."""
    k_w, k_b = jax.random.split(key)
    bound = 1.0 / jnp.sqrt(jnp.asarray(hid_feats, dtype))
    weight = jax.random.uniform(k_w, (out_feats, hid_feats), dtype,
                                minval=-bound, maxval=bound)
    bias = jax.random.uniform(k_b, (out_feats,), dtype,
                              minval=-bound, maxval=bound)
    return weight, bias


if __name__ == "__main__":
    key = jax.random.PRNGKey(0)
    k_h, k_p, k_h2, k_p2 = jax.random.split(key, 4)

    # Case 1: tiny shapes consistent with the module (hid_feats=32 -> out_feats=8).
    N, hid_feats, out_feats = 8, 32, 8
    h = jax.random.normal(k_h, (N, hid_feats), jnp.float32)
    weight, bias = init_linear_params(k_p, hid_feats, out_feats)
    w_t, b2, o_feats = prepare_linear_params(weight, bias)

    out = gcn_base_forward(None, h, w_t, b2, o_feats, force_pallas=True)
    out = jax.block_until_ready(out)
    ref = h @ weight.T + bias
    assert out.shape == (N, out_feats)
    assert jnp.allclose(out, ref, atol=5e-2, rtol=5e-2), "case 1 mismatch"

    # Case 2: non-(8,128)-multiple shapes -> exercises partial edge blocks.
    N2, hid2, out2 = 300, 96, 10
    h2 = jax.random.normal(k_h2, (N2, hid2), jnp.float32)
    w2, bvec2 = init_linear_params(k_p2, hid2, out2)
    w2_t, b2_2, o2 = prepare_linear_params(w2, bvec2)

    out2_arr = classify_emb_pallas(h2, w2_t, b2_2, o2, force_pallas=True)
    out2_arr = jax.block_until_ready(out2_arr)
    ref2 = h2 @ w2.T + bvec2
    assert out2_arr.shape == (N2, out2)
    assert jnp.allclose(out2_arr, ref2, atol=5e-2, rtol=5e-2), "case 2 mismatch"

    print("KERNEL_OK")
</pallas_src>

<mosaic_0001>
module attributes {stable_mosaic.version = 11 : i64} {
  func.func @_linear_kernel(%arg0: i32, %arg1: i32, %arg2: memref<8x32xf32, #tpu.memory_space<vmem>>, %arg3: memref<32x128xbf16, #tpu.memory_space<vmem>>, %arg4: memref<1x128xf32, #tpu.memory_space<vmem>>, %arg5: memref<8x128xf32, #tpu.memory_space<vmem>>) attributes {dimension_semantics = [#tpu.dimension_semantics<parallel>, #tpu.dimension_semantics<parallel>], iteration_bounds = array<i64: 1, 1>, scalar_prefetch = 0 : i64, scratch_operands = 0 : i64, tpu.core_type = #tpu.core_type<tc>, window_params = [{transform_indices = @transform_0, window_bounds = array<i64: 8, 32>}, {transform_indices = @transform_1, window_bounds = array<i64: 32, 128>}, {transform_indices = @transform_2, window_bounds = array<i64: 1, 128>}, {transform_indices = @transform_3, window_bounds = array<i64: 8, 128>}]} {
    %c0 = arith.constant 0 : index
    %c0_0 = arith.constant 0 : index
    %0 = vector.load %arg2[%c0, %c0_0] : memref<8x32xf32, #tpu.memory_space<vmem>>, vector<8x32xf32>
    %1 = arith.truncf %0 : vector<8x32xf32> to vector<8x32xbf16>
    %c0_1 = arith.constant 0 : index
    %c0_2 = arith.constant 0 : index
    %2 = vector.load %arg3[%c0_1, %c0_2] : memref<32x128xbf16, #tpu.memory_space<vmem>>, vector<32x128xbf16>
    %cst = arith.constant dense<0.000000e+00> : vector<8x128xf32>
    %3 = tpu.matmul %1, %2, %cst {dimension_numbers = #tpu.dot_dimension_numbers<[1], [0], [0], [1], [0, 0, 1, 1], [], []>} : vector<8x32xbf16>, vector<32x128xbf16>, vector<8x128xf32> -> vector<8x128xf32>
    %c0_3 = arith.constant 0 : index
    %c0_4 = arith.constant 0 : index
    %4 = vector.load %arg4[%c0_3, %c0_4] : memref<1x128xf32, #tpu.memory_space<vmem>>, vector<1x128xf32>
    %5 = vector.broadcast %4 : vector<1x128xf32> to vector<8x128xf32>
    %6 = arith.addf %3, %5 : vector<8x128xf32>
    %c0_5 = arith.constant 0 : index
    %c0_6 = arith.constant 0 : index
    %7 = vector.load %arg5[%c0_5, %c0_6] : memref<8x128xf32, #tpu.memory_space<vmem>>, vector<8x128xf32>
    tpu.vector_store %arg5[%c0_5, %c0_6], %6 {strides = array<i32>} : memref<8x128xf32, #tpu.memory_space<vmem>>, vector<8x128xf32>,
    return
  }
  func.func @transform_0(%arg0: i32, %arg1: i32) -> (i32, i32) {
    %c0_i32 = arith.constant 0 : i32
    %c0_i32_0 = arith.constant 0 : i32
    return %arg0, %c0_i32 : i32, i32
  }
  func.func @transform_1(%arg0: i32, %arg1: i32) -> (i32, i32) {
    %c0_i32 = arith.constant 0 : i32
    %c0_i32_0 = arith.constant 0 : i32
    return %c0_i32, %arg1 : i32, i32
  }
  func.func @transform_2(%arg0: i32, %arg1: i32) -> (i32, i32) {
    %c0_i32 = arith.constant 0 : i32
    %c0_i32_0 = arith.constant 0 : i32
    return %c0_i32, %arg1 : i32, i32
  }
  func.func @transform_3(%arg0: i32, %arg1: i32) -> (i32, i32) {
    %c0_i32 = arith.constant 0 : i32
    return %arg0, %arg1 : i32, i32
  }
}

</mosaic_0001>

<bundles_post_ra>
// kernel: tpu_custom_call.1
= control target key start
LH: loop header
LB: loop body
LE: loop exit
PB: predicated region body
PF: predicated region fallthrough
CT: control target
= control target key end

     0   :  { %8 = vsyncpa [#allocation3], 0  ;;  %s297_s0 = inlined_call_operand.hbm [shape: f32[8,32], index: 0, kind: input, shape index: {}]   ;;  %s298_s1 = inlined_call_operand.hbm [shape: bf16[32,128], index: 1, kind: input, shape index: {}]   ;;  %s299_s2 = inlined_call_operand.vmem [shape: f32[1,128], index: 2, kind: input, shape index: {}]   ;;  %s300_s3 = inlined_call_operand.hbm [shape: f32[8,128], index: 3, kind: output, shape index: {}]  }
   0x1   :  { %9 = vsyncpa [#allocation6], 0 }
   0x2   :  { %10 = vsyncpa [#allocation4], 0  ;;  %s224_s12 = smov [#allocation2]   ;;  %s225_s14 = smov [#allocation5]  }
   0x3   :  { %s17_s13 = sshll.u32 %s224_s12, 4  ;;  %s26_s15 = sshll.u32 %s225_s14, 4  ;;  %s18_s13 = int_to_ptr.vmem [resolvable:$true] %s17_s13  ;;  %s251_s15 = int_to_ptr.vmem [resolvable:$true] %s26_s15 }
   0x4   :  { %s152_s18 = scalar_lea.hbm %s297_s0, 128 }
   0x5   :  { %p153_p0 = scmp.ne.s32.totalorder %s297_s0, %s152_s18  ;;  %p156_p1 = scmp.lt.u32.totalorder %s152_s18, %s297_s0 }
   0x7   :  { %p158_p2 = pnand %p156_p1, %p153_p0 }
   0x9   :  { %161 = shalt.err (!%p158_p2)
}
   0xa   :  { %s162_s23 = scalar_lea.vmem %s18_s13, 128  ;;  %p167_p4 = scmp.lt.s32.totalorder %s18_s13, %s18_s13 }
   0xb   :  { %p163_p3 = scmp.ne.s32.totalorder %s18_s13, %s162_s23  ;;  %p168_p5 = scmp.lt.s32.totalorder %s162_s23, %s162_s23 }
   0xd   :  { %p169_p6 = por %p168_p5, %p167_p4 }
   0xf   :  { %p170_p7 = pnand %p169_p6, %p163_p3 }
  0x11   :  { %173 = shalt.err (!%p170_p7)
}
  0x12   :  { %20 = dma.hbm_to_vmem [thread:$0]  %s297_s0, 128, %s18_s13, [#allocation3]  }
  0x13   :  { %s174_s28 = scalar_lea.hbm %s298_s1, 256 }
  0x14   :  { %p175_p8 = scmp.ne.s32.totalorder %s298_s1, %s174_s28  ;;  %p178_p9 = scmp.lt.u32.totalorder %s174_s28, %s298_s1 }
  0x16   :  { %p180_p10 = pnand %p178_p9, %p175_p8 }
  0x18   :  { %183 = shalt.err (!%p180_p10)
}
  0x19   :  { %s184_s6 = scalar_lea.vmem %s251_s15, 256  ;;  %p189_p12 = scmp.lt.s32.totalorder %s251_s15, %s251_s15 }
  0x1a   :  { %p185_p11 = scmp.ne.s32.totalorder %s251_s15, %s184_s6  ;;  %p190_p13 = scmp.lt.s32.totalorder %s184_s6, %s184_s6 }
  0x1c   :  { %p191_p0 = por %p190_p13, %p189_p12 }
  0x1e   :  { %p192_p1 = pnand %p191_p0, %p185_p11 }
  0x20   :  { %195 = shalt.err (!%p192_p1)
}
  0x21   :  { %s226_s0 = smov 64   ;;  %s227_s7 = smov 4  }
  0x22   :  { %32 = dma.hbm_to_vmem [thread:$0]  %s298_s1, 256, %s251_s15, [#allocation6], %s226_s0, %s226_s0, %s227_s7  }
  0x23   :  { %218 = dma.done.wait [#allocation3], 128  }
  0x24   :  { %219 = vsyncadd [#allocation3], 4294967168 }
  0x25   :  { %220 = dma.done.wait [#allocation6], 256  }
  0x26   :  { %221 = vsyncadd [#allocation6], 4294967040  ;;  %v228_v0 = vmov 0.0   ;;  %vm229_vm0 = vmmov 0   ;;  %v150_v1 = vld [vmem:[#allocation5] sm:$0xff]   ;;  %v151_v2 = vld [vmem:[#allocation5 + $0x8] sm:$0xff]  }
  0x27   :  { %135 = vmatprep.subr.bf16.mxu0 %v228_v0  ;;  %139 = vmatprep.mubr.msk.bf16.mxu0 %vm229_vm0, %v228_v0  ;;  %v42_v3 = vld [vmem:[#allocation2] sm:$0xff]  ;;  %vm67_vm1 = vcmask 261120   ;;  %s230_s1 = smov [#allocation7]  }
  0x28   :  { %136 = vmatpush3.bf16.msra.mxu0 %v150_v1  ;;  %v43_v4 = vpack.c.bf16 %v42_v3, %v42_v3  ;;  %v128_v5 = vld [vmem:[%s299_s2] ss:$0 sm:$0xff]  ;;  %s118_s12 = sshll.u32 %s230_s1, 4  ;;  %s119_s12 = int_to_ptr.vmem [resolvable:$true] %s118_s12 }
  0x29   :  { %137 = vmatprep.subr.bf16.mxu0 %v228_v0  ;;  %s196_s13 = scalar_lea.vmem %s119_s12, 128  ;;  %p201_p3 = scmp.lt.s32.totalorder %s119_s12, %s119_s12 }
  0x2a   :  { %p197_p2 = scmp.ne.s32.totalorder %s119_s12, %s196_s13  ;;  %p202_p4 = scmp.lt.s32.totalorder %s196_s13, %s196_s13 }
  0x2c   :  { %138 = vmatpush3.bf16.msra.mxu0 %v151_v2  ;;  %p203_p5 = por %p202_p4, %p201_p3 }
  0x2e   :  { %p204_p6 = pnand %p203_p5, %p197_p2 }
  0x2f   :  { %140 = vmatmul.mubr.msk.bf16.vlgmr.msra.gmra.mrb[0].mxu0 %vm67_vm1, %v43_v4 }
 0x102   :  { %v105_v6 = vpop.f32.mrb[0].mxu0 }
 0x103   :  { %v106_v7 = vadd.f32 %v128_v5, %v105_v6  ;;  %v141_v8 = vpop.f32.mrb[1].mxu0 }
 0x104   :  { %v108_v9 = vpop.f32.mrb[2].mxu0 }
 0x105   :  { %111 = vst [vmem:[#allocation7] sm:$0xff] %v106_v7  ;;  %v142_v10 = vpop.f32.mrb[3].mxu0 }
 0x106   :  { %207 = shalt.err (!%p204_p6)
}
 0x107   :  { %s208_s2 = scalar_lea.hbm %s300_s3, 128 }
 0x108   :  { %p209_p7 = scmp.ne.s32.totalorder %s300_s3, %s208_s2  ;;  %p212_p8 = scmp.lt.u32.totalorder %s208_s2, %s300_s3 }
 0x10a   :  { %p214_p9 = pnand %p212_p8, %p209_p7 }
 0x10c   :  { %217 = shalt.err (!%p214_p9)
}
 0x10d   :  { %121 = dma.vmem_to_hbm [thread:$0]  %s119_s12, 128, %s300_s3, [#allocation4]  }
 0x10e   :  { %222 = dma.done.wait [#allocation4], 128  }
 0x10f   :  { %223 = vsyncadd [#allocation4], 4294967168 }
 0x110   :  { %125 = vsyncpa [#allocation3], 1 }
 0x111   :  { %126 = vsyncpa [#allocation6], 1 }
 0x112   :  { %127 = vsyncpa [#allocation4], 1 }

</bundles_post_ra>
